<compile_context>
chip_gen: v7x
topology: tpu7x:2x2x1
jax: 0.10.0
libtpu: 0.0.40
codegen_flags: <defaults>
</compile_context>

<pallas_src>
import math
from functools import partial

import numpy as np
import jax
import jax.numpy as jnp
from jax.experimental import pallas as pl
from jax.experimental.pallas import tpu as pltpu


def _round_up(x, m):
    return ((x + m - 1) // m) * m


def _fused_modulator_kernel(n_layers, dim_hidden, mm_dtype,
                            z_ref, wz_all_ref, b_all_ref, *rest):
    """One fused Modulator forward for a TM-row batch tile.

    z_ref:      (TM, dim_in)      activations
    wz_all_ref: (dim_in, W_out)   [W0 | Wz_1 | ... | Wz_{L-1}], lane-padded
    b_all_ref:  (1, W_out)        [b0 | b1 | ... | b_{L-1}],    lane-padded
    rest:       wh_1 .. wh_{L-1}  each (H, H), then out_ref (TM, W_out)

    All hiddens are packed into one lane-dense W_out-wide slab so the HBM
    writeback is a single unmasked full-lane store per tile.
    """
    H = dim_hidden
    wh_refs = rest[:n_layers - 1]
    out_ref = rest[-1]

    z = z_ref[...].astype(mm_dtype)

    # All z-path matmuls (K = dim_in is tiny) fused into ONE wide-N matmul.
    # Column group l of zc holds z @ Wz_l + b_l (group 0 is layer 0's product).
    zc = jnp.dot(z, wz_all_ref[...], preferred_element_type=jnp.float32)
    zc = zc + b_all_ref[...]

    h = jnp.maximum(zc[:, 0:H], 0.0)                       # layer 0
    hiddens = [h]
    for l in range(1, n_layers):
        # cat([h, z], 1) @ W_l  ==  h @ Wh_l + z @ Wz_l   (Wz_l term lives in zc)
        acc = jnp.dot(h.astype(mm_dtype), wh_refs[l - 1][...],
                      preferred_element_type=jnp.float32)
        acc = acc + zc[:, l * H:(l + 1) * H]
        h = jnp.maximum(acc, 0.0)
        hiddens.append(h)

    lane_pad = out_ref.shape[1] - n_layers * H
    if lane_pad:
        hiddens.append(jnp.zeros((out_ref.shape[0], lane_pad), jnp.float32))
    out_ref[...] = jnp.concatenate(hiddens, axis=1).astype(out_ref.dtype)


def pack_modulator_params(weights, biases, matmul_dtype=jnp.float32):
    """One-time packing of Modulator weights for the fused kernel.

    weights[l]: (dim_in, H) for l == 0, (H + dim_in, H) otherwise (torch W.T).
    biases[l]:  (1, H)
    Use matmul_dtype=jnp.bfloat16 on v6e/v7x for ~3x MXU throughput
    (accumulation stays f32 in-kernel).
    """
    n_layers = len(weights)
    dim_in, H = weights[0].shape
    W_out = _round_up(n_layers * H, 128)        # lane-dense packed output width
    lane_pad = W_out - n_layers * H

    # z-path weights: layer 0's full weight plus each later layer's bottom
    # (dim_in) rows, concatenated along the output axis and lane-padded.
    wz_parts = [weights[0]] + [weights[l][H:, :] for l in range(1, n_layers)]
    wz_all = jnp.pad(jnp.concatenate(wz_parts, axis=1), ((0, 0), (0, lane_pad)))
    b_all = jnp.pad(jnp.concatenate(biases, axis=1), ((0, 0), (0, lane_pad)))
    # h-path weights: top H rows of each layer>=1 weight (exact split, no pad).
    wh_list = tuple(weights[l][:H, :].astype(matmul_dtype)
                    for l in range(1, n_layers))

    return dict(
        wz_all=wz_all.astype(matmul_dtype),
        b_all=b_all.astype(jnp.float32),      # bias added post-accumulation (f32)
        wh=wh_list,
        dim_in=dim_in,
        dim_hidden=H,
        n_layers=n_layers,
        w_out=W_out,
        matmul_dtype=matmul_dtype,
    )


_TM_CAP = 1024   # rows per batch tile (512 left ~35% of step time as overhead)


def modulator_forward(z, params):
    """Reproduces Modulator.forward with one fused Pallas call.
    z: (batch, dim_in) -> tuple of n_layers arrays, each (batch, dim_hidden)."""
    M, dim_in = z.shape
    n_layers = params["n_layers"]
    H = params["dim_hidden"]
    W_out = params["w_out"]
    mm_dtype = params["matmul_dtype"]
    assert dim_in == params["dim_in"]

    # Row tiling: moderate batches split into exactly two tiles so the
    # "parallel" axis can occupy both of v7x's TensorCores; large batches
    # tile at _TM_CAP rows; tiny batches use one tile.
    M8 = _round_up(M, 8)
    if M8 < 16:
        TM = M8
    elif M8 <= 2 * _TM_CAP:
        TM = _round_up(-(-M8 // 2), 8)
    else:
        TM = _TM_CAP
    M_pad = _round_up(M8, TM)
    z_p = z if M_pad == M else jnp.pad(z, ((0, M_pad - M), (0, 0)))

    def resident(shape):
        # Constant index_map -> block stays resident in VMEM across grid steps.
        # TODO(synk): pipeline_mode=pl.Buffered(1) once H / n_layers grow enough
        # for double-buffered resident weights to pressure VMEM (v7x, 64 MiB).
        return pl.BlockSpec(shape, lambda i: (0, 0))

    inputs = [z_p, params["wz_all"], params["b_all"], *params["wh"]]
    in_specs = [
        pl.BlockSpec((TM, dim_in), lambda i: (i, 0)),
        resident((dim_in, W_out)),
        resident((1, W_out)),
    ] + [resident((H, H)) for _ in range(n_layers - 1)]

    w_itemsize = np.dtype(mm_dtype).itemsize
    z_itemsize = np.dtype(z.dtype).itemsize
    flops = 2 * M_pad * dim_in * W_out + 2 * M_pad * H * H * (n_layers - 1)
    bytes_accessed = (
        M_pad * dim_in * z_itemsize
        + (dim_in * W_out + (n_layers - 1) * H * H) * w_itemsize
        + W_out * 4
        + M_pad * W_out * z_itemsize
    )

    out = pl.pallas_call(
        partial(_fused_modulator_kernel, n_layers, H, mm_dtype),
        out_shape=jax.ShapeDtypeStruct((M_pad, W_out), z.dtype),
        grid_spec=pl.GridSpec(
            grid=(M_pad // TM,),
            in_specs=in_specs,
            out_specs=pl.BlockSpec((TM, W_out), lambda i: (i, 0)),
        ),
        compiler_params=pltpu.CompilerParams(
            dimension_semantics=("parallel",),      # batch tiles shard across TCs
            vmem_limit_bytes=32 * 1024 * 1024,      # headroom on v7x's 64 MiB VMEM
        ),
        cost_estimate=pl.CostEstimate(
            flops=flops, transcendentals=0, bytes_accessed=bytes_accessed),
    )(*inputs)

    # Un-pack the lane-packed slab into the per-layer tuple (strip row pad).
    # TODO(synk): bf16 out_shape would further halve writeback on v6e/v7x.
    return tuple(out[:M, l * H:(l + 1) * H] for l in range(n_layers))


def init_modulator_params(key, dim_in, dim_hidden, n_layers, dtype=jnp.float32):
    """Deterministic init mimicking nn.Linear's uniform(-1/sqrt(fan_in)).
    Weights stored as (in_features, out_features) == pytorch weight.T."""
    weights, biases = [], []
    for ind in range(n_layers):
        dim = dim_in if ind == 0 else dim_hidden + dim_in
        key, kw, kb = jax.random.split(key, 3)
        bound = 1.0 / math.sqrt(dim)
        weights.append(jax.random.uniform(kw, (dim, dim_hidden), dtype, -bound, bound))
        biases.append(jax.random.uniform(kb, (1, dim_hidden), dtype, -bound, bound))
    return weights, biases


def modulator_reference(z, weights, biases):
    """Pure-JAX reference (mirrors the torch module exactly)."""
    x = z
    hiddens = []
    for w, b in zip(weights, biases):
        h = jnp.maximum(x @ w + b, 0.0)
        hiddens.append(h)
        x = jnp.concatenate((h, z), axis=1)
    return tuple(hiddens)


if __name__ == "__main__":
    batch = 8
    dim_in = 32
    dim_hidden = 64
    n_layers = 3

    key = jax.random.PRNGKey(0)
    key, kz = jax.random.split(key)
    z = jax.random.normal(kz, (batch, dim_in), jnp.float32)
    weights, biases = init_modulator_params(key, dim_in, dim_hidden, n_layers)
    refs = modulator_reference(z, weights, biases)

    # f32 matmul path (bit-tight vs reference).
    packed_f32 = pack_modulator_params(weights, biases)
    outs = jax.block_until_ready(modulator_forward(z, packed_f32))
    for o, r in zip(outs, refs):
        assert o.shape == (batch, dim_hidden)
        assert jnp.allclose(o, r, atol=3e-5, rtol=3e-5), "f32 mismatch vs reference"

    # bf16-operand path (recommended on v6e/v7x; f32 accumulation, looser tol).
    packed_bf16 = pack_modulator_params(weights, biases, matmul_dtype=jnp.bfloat16)
    outs_bf16 = jax.block_until_ready(modulator_forward(z, packed_bf16))
    for o, r in zip(outs_bf16, refs):
        assert o.shape == (batch, dim_hidden)
        assert jnp.allclose(o, r, atol=5e-2, rtol=5e-2), "bf16 mismatch vs reference"

    print("KERNEL_OK")
</pallas_src>

<mosaic_0001>
module attributes {stable_mosaic.version = 11 : i64} {
  func.func @_fused_modulator_kernel(%arg0: i32, %arg1: memref<8x32xf32, #tpu.memory_space<vmem>>, %arg2: memref<32x256xf32, #tpu.memory_space<vmem>>, %arg3: memref<1x256xf32, #tpu.memory_space<vmem>>, %arg4: memref<64x64xf32, #tpu.memory_space<vmem>>, %arg5: memref<64x64xf32, #tpu.memory_space<vmem>>, %arg6: memref<8x256xf32, #tpu.memory_space<vmem>>) attributes {dimension_semantics = [#tpu.dimension_semantics<parallel>], iteration_bounds = array<i64: 1>, scalar_prefetch = 0 : i64, scratch_operands = 0 : i64, tpu.core_type = #tpu.core_type<tc>, window_params = [{transform_indices = @transform_0, window_bounds = array<i64: 8, 32>}, {pipeline_mode = #tpu.pipeline_mode<synchronous>, transform_indices = @transform_1, window_bounds = array<i64: 32, 256>}, {pipeline_mode = #tpu.pipeline_mode<synchronous>, transform_indices = @transform_2, window_bounds = array<i64: 1, 256>}, {pipeline_mode = #tpu.pipeline_mode<synchronous>, transform_indices = @transform_3, window_bounds = array<i64: 64, 64>}, {pipeline_mode = #tpu.pipeline_mode<synchronous>, transform_indices = @transform_4, window_bounds = array<i64: 64, 64>}, {transform_indices = @transform_5, window_bounds = array<i64: 8, 256>}]} {
    %c0 = arith.constant 0 : index
    %c0_0 = arith.constant 0 : index
    %0 = vector.load %arg1[%c0, %c0_0] : memref<8x32xf32, #tpu.memory_space<vmem>>, vector<8x32xf32>
    %c0_1 = arith.constant 0 : index
    %c0_2 = arith.constant 0 : index
    %1 = vector.load %arg2[%c0_1, %c0_2] : memref<32x256xf32, #tpu.memory_space<vmem>>, vector<32x256xf32>
    %cst = arith.constant dense<0.000000e+00> : vector<8x256xf32>
    %2 = tpu.matmul %0, %1, %cst {dimension_numbers = #tpu.dot_dimension_numbers<[1], [0], [0], [1], [0, 0, 1, 1], [], []>} : vector<8x32xf32>, vector<32x256xf32>, vector<8x256xf32> -> vector<8x256xf32>
    %c0_3 = arith.constant 0 : index
    %c0_4 = arith.constant 0 : index
    %3 = vector.load %arg3[%c0_3, %c0_4] : memref<1x256xf32, #tpu.memory_space<vmem>>, vector<1x256xf32>
    %4 = vector.broadcast %3 : vector<1x256xf32> to vector<8x256xf32>
    %5 = arith.addf %2, %4 : vector<8x256xf32>
    %6 = vector.extract_strided_slice %5 {offsets = [0, 0], sizes = [8, 64], strides = [1, 1]} : vector<8x256xf32> to vector<8x64xf32>
    %cst_5 = arith.constant 0.000000e+00 : f32
    %7 = vector.broadcast %cst_5 : f32 to vector<8x64xf32>
    %8 = arith.maximumf %6, %7 : vector<8x64xf32>
    %c0_6 = arith.constant 0 : index
    %c0_7 = arith.constant 0 : index
    %9 = vector.load %arg4[%c0_6, %c0_7] : memref<64x64xf32, #tpu.memory_space<vmem>>, vector<64x64xf32>
    %cst_8 = arith.constant dense<0.000000e+00> : vector<8x64xf32>
    %10 = tpu.matmul %8, %9, %cst_8 {dimension_numbers = #tpu.dot_dimension_numbers<[1], [0], [0], [1], [0, 0, 1, 1], [], []>} : vector<8x64xf32>, vector<64x64xf32>, vector<8x64xf32> -> vector<8x64xf32>
    %11 = vector.extract_strided_slice %5 {offsets = [0, 64], sizes = [8, 64], strides = [1, 1]} : vector<8x256xf32> to vector<8x64xf32>
    %12 = arith.addf %10, %11 : vector<8x64xf32>
    %cst_9 = arith.constant 0.000000e+00 : f32
    %13 = vector.broadcast %cst_9 : f32 to vector<8x64xf32>
    %14 = arith.maximumf %12, %13 : vector<8x64xf32>
    %c0_10 = arith.constant 0 : index
    %c0_11 = arith.constant 0 : index
    %15 = vector.load %arg5[%c0_10, %c0_11] : memref<64x64xf32, #tpu.memory_space<vmem>>, vector<64x64xf32>
    %cst_12 = arith.constant dense<0.000000e+00> : vector<8x64xf32>
    %16 = tpu.matmul %14, %15, %cst_12 {dimension_numbers = #tpu.dot_dimension_numbers<[1], [0], [0], [1], [0, 0, 1, 1], [], []>} : vector<8x64xf32>, vector<64x64xf32>, vector<8x64xf32> -> vector<8x64xf32>
    %17 = vector.extract_strided_slice %5 {offsets = [0, 128], sizes = [8, 64], strides = [1, 1]} : vector<8x256xf32> to vector<8x64xf32>
    %18 = arith.addf %16, %17 : vector<8x64xf32>
    %cst_13 = arith.constant 0.000000e+00 : f32
    %19 = vector.broadcast %cst_13 : f32 to vector<8x64xf32>
    %20 = arith.maximumf %18, %19 : vector<8x64xf32>
    %cst_14 = arith.constant 0.000000e+00 : f32
    %21 = vector.broadcast %cst_14 : f32 to vector<8x64xf32>
    %22 = tpu.concatenate %8, %14, %20, %21 in 1 : vector<8x64xf32>, vector<8x64xf32>, vector<8x64xf32>, vector<8x64xf32> -> vector<8x256xf32>
    %c0_15 = arith.constant 0 : index
    %c0_16 = arith.constant 0 : index
    %23 = vector.load %arg6[%c0_15, %c0_16] : memref<8x256xf32, #tpu.memory_space<vmem>>, vector<8x256xf32>
    tpu.vector_store %arg6[%c0_15, %c0_16], %22 {strides = array<i32>} : memref<8x256xf32, #tpu.memory_space<vmem>>, vector<8x256xf32>,
    return
  }
  func.func @transform_0(%arg0: i32) -> (i32, i32) {
    %c0_i32 = arith.constant 0 : i32
    %c0_i32_0 = arith.constant 0 : i32
    return %arg0, %c0_i32 : i32, i32
  }
  func.func @transform_1(%arg0: i32) -> (i32, i32) {
    %c0_i32 = arith.constant 0 : i32
    %c0_i32_0 = arith.constant 0 : i32
    %c0_i32_1 = arith.constant 0 : i32
    return %c0_i32, %c0_i32_0 : i32, i32
  }
  func.func @transform_2(%arg0: i32) -> (i32, i32) {
    %c0_i32 = arith.constant 0 : i32
    %c0_i32_0 = arith.constant 0 : i32
    %c0_i32_1 = arith.constant 0 : i32
    return %c0_i32, %c0_i32_0 : i32, i32
  }
  func.func @transform_3(%arg0: i32) -> (i32, i32) {
    %c0_i32 = arith.constant 0 : i32
    %c0_i32_0 = arith.constant 0 : i32
    %c0_i32_1 = arith.constant 0 : i32
    return %c0_i32, %c0_i32_0 : i32, i32
  }
  func.func @transform_4(%arg0: i32) -> (i32, i32) {
    %c0_i32 = arith.constant 0 : i32
    %c0_i32_0 = arith.constant 0 : i32
    %c0_i32_1 = arith.constant 0 : i32
    return %c0_i32, %c0_i32_0 : i32, i32
  }
  func.func @transform_5(%arg0: i32) -> (i32, i32) {
    %c0_i32 = arith.constant 0 : i32
    %c0_i32_0 = arith.constant 0 : i32
    return %arg0, %c0_i32 : i32, i32
  }
}

</mosaic_0001>

<bundles_post_ra>
// kernel: tpu_custom_call.1
= control target key start
LH: loop header
LB: loop body
LE: loop exit
PB: predicated region body
PF: predicated region fallthrough
CT: control target
= control target key end

     0   :  { %10 = vsyncpa [#allocation3], 0  ;;  %s704_s0 = inlined_call_operand.hbm [shape: f32[8,32], index: 0, kind: input, shape index: {}]   ;;  %s705_s1 = inlined_call_operand.hbm [shape: f32[32,256], index: 1, kind: input, shape index: {}]   ;;  %s706_s2 = inlined_call_operand.vmem [shape: f32[1,256], index: 2, kind: input, shape index: {}]   ;;  %s707_s3 = inlined_call_operand.hbm [shape: f32[64,64], index: 3, kind: input, shape index: {}]   ;;  %s708_s4 = inlined_call_operand.hbm [shape: f32[64,64], index: 4, kind: input, shape index: {}]   ;;  %s709_s5 = inlined_call_operand.hbm [shape: f32[8,256], index: 5, kind: output, shape index: {}]  }
   0x1   :  { %11 = vsyncpa [#allocation6], 0 }
   0x2   :  { %12 = vsyncpa [#allocation9], 0 }
   0x3   :  { %13 = vsyncpa [#allocation4], 0  ;;  %s586_s18 = smov [#allocation5]   ;;  %s468_s22 = scalar_lea.hbm %s705_s1, 1024 }
   0x4   :  { %s29_s19 = sshll.u32 %s586_s18, 4  ;;  %p469_p0 = scmp.ne.s32.totalorder %s705_s1, %s468_s22  ;;  %s30_s19 = int_to_ptr.vmem [resolvable:$true] %s29_s19 }
   0x5   :  { %p472_p1 = scmp.lt.u32.totalorder %s468_s22, %s705_s1 }
   0x7   :  { %p474_p2 = pnand %p472_p1, %p469_p0 }
   0x9   :  { %477 = shalt.err (!%p474_p2)
}
   0xa   :  { %s478_s27 = scalar_lea.vmem %s30_s19, 1024  ;;  %p483_p4 = scmp.lt.s32.totalorder %s30_s19, %s30_s19 }
   0xb   :  { %p479_p3 = scmp.ne.s32.totalorder %s30_s19, %s478_s27  ;;  %p484_p5 = scmp.lt.s32.totalorder %s478_s27, %s478_s27 }
   0xd   :  { %p485_p6 = por %p484_p5, %p483_p4 }
   0xf   :  { %p486_p7 = pnand %p485_p6, %p479_p3 }
  0x11   :  { %489 = shalt.err (!%p486_p7)
}
  0x12   :  { %s587_s28 = smov 256   ;;  %s588_s29 = smov 16  }
  0x13   :  { %35 = dma.hbm_to_vmem [thread:$0]  %s705_s1, 1024, %s30_s19, [#allocation6], %s587_s28, %s587_s28, %s588_s29  }
  0x14   :  { %s589_s7 = smov [#allocation2]   ;;  %s590_s9 = smov [#allocation7]  }
  0x15   :  { %s20_s8 = sshll.u32 %s589_s7, 4  ;;  %s43_s10 = sshll.u32 %s590_s9, 4  ;;  %s21_s8 = int_to_ptr.vmem [resolvable:$true] %s20_s8  ;;  %s44_s10 = int_to_ptr.vmem [resolvable:$true] %s43_s10 }
  0x16   :  { %s490_s13 = scalar_lea.hbm %s704_s0, 128 }
  0x17   :  { %p491_p8 = scmp.ne.s32.totalorder %s704_s0, %s490_s13  ;;  %p494_p9 = scmp.lt.u32.totalorder %s490_s13, %s704_s0 }
  0x19   :  { %p496_p10 = pnand %p494_p9, %p491_p8 }
  0x1b   :  { %499 = shalt.err (!%p496_p10)
}
  0x1c   :  { %s500_s1 = scalar_lea.vmem %s21_s8, 128  ;;  %p505_p12 = scmp.lt.s32.totalorder %s21_s8, %s21_s8 }
  0x1d   :  { %p501_p11 = scmp.ne.s32.totalorder %s21_s8, %s500_s1  ;;  %p506_p13 = scmp.lt.s32.totalorder %s500_s1, %s500_s1 }
  0x1f   :  { %p507_p0 = por %p506_p13, %p505_p12 }
  0x21   :  { %p508_p1 = pnand %p507_p0, %p501_p11 }
  0x23   :  { %511 = shalt.err (!%p508_p1)
}
  0x24   :  { %23 = dma.hbm_to_vmem [thread:$0]  %s704_s0, 128, %s21_s8, [#allocation3]  }
  0x25   :  { %s512_s22 = scalar_lea.hbm %s707_s3, 1024 }
  0x26   :  { %p513_p2 = scmp.ne.s32.totalorder %s707_s3, %s512_s22  ;;  %p516_p3 = scmp.lt.u32.totalorder %s512_s22, %s707_s3 }
  0x28   :  { %p518_p4 = pnand %p516_p3, %p513_p2 }
  0x2a   :  { %521 = shalt.err (!%p518_p4)
}
  0x2b   :  { %s522_s27 = scalar_lea.vmem %s44_s10, 1024  ;;  %p527_p6 = scmp.lt.s32.totalorder %s44_s10, %s44_s10 }
  0x2c   :  { %p523_p5 = scmp.ne.s32.totalorder %s44_s10, %s522_s27  ;;  %p528_p7 = scmp.lt.s32.totalorder %s522_s27, %s522_s27 }
  0x2e   :  { %p529_p8 = por %p528_p7, %p527_p6 }
  0x30   :  { %p530_p9 = pnand %p529_p8, %p523_p5 }
  0x32   :  { %533 = shalt.err (!%p530_p9)
}
  0x33   :  { %s591_s0 = smov 128   ;;  %s592_s28 = smov 8  }
  0x34   :  { %49 = dma.hbm_to_vmem [thread:$0]  %s707_s3, 1024, %s44_s10, [#allocation6], %s591_s0, %s591_s0, %s592_s28  }
  0x35   :  { %s593_s6 = smov [#allocation8]   ;;  %s534_s11 = scalar_lea.hbm %s708_s4, 1024 }
  0x36   :  { %s55_s7 = sshll.u32 %s593_s6, 4  ;;  %p535_p10 = scmp.ne.s32.totalorder %s708_s4, %s534_s11  ;;  %s56_s7 = int_to_ptr.vmem [resolvable:$true] %s55_s7 }
  0x37   :  { %p538_p11 = scmp.lt.u32.totalorder %s534_s11, %s708_s4 }
  0x39   :  { %p540_p12 = pnand %p538_p11, %p535_p10 }
  0x3b   :  { %543 = shalt.err (!%p540_p12)
}
  0x3c   :  { %s544_s16 = scalar_lea.vmem %s56_s7, 1024  ;;  %p549_p0 = scmp.lt.s32.totalorder %s56_s7, %s56_s7 }
  0x3d   :  { %p545_p13 = scmp.ne.s32.totalorder %s56_s7, %s544_s16  ;;  %p550_p1 = scmp.lt.s32.totalorder %s544_s16, %s544_s16 }
  0x3f   :  { %p551_p2 = por %p550_p1, %p549_p0 }
  0x41   :  { %p552_p3 = pnand %p551_p2, %p545_p13 }
  0x43   :  { %555 = shalt.err (!%p552_p3)
}
  0x44   :  { %61 = dma.hbm_to_vmem [thread:$0]  %s708_s4, 1024, %s56_s7, [#allocation9], %s591_s0, %s591_s0, %s592_s28  }
  0x45   :  { %578 = dma.done.wait [#allocation3], 128  }
  0x46   :  { %579 = vsyncadd [#allocation3], 4294967168 }
  0x47   :  { %580 = dma.done.wait [#allocation6], 2048  }
  0x48   :  { %581 = vsyncadd [#allocation6], 4294965248 }
  0x49   :  { %582 = dma.done.wait [#allocation9], 1024  }
  0x4a   :  { %583 = vsyncadd [#allocation9], 4294966272  ;;  %v594_v0 = vmov 0.0   ;;  %v595_v1 = vmov 0.0|0.0   ;;  %v76_v2 = vld [vmem:[#allocation5 + $0x8] sm:$0xff]  ;;  %v78_v3 = vld [vmem:[#allocation5 + $0x18] sm:$0xff]  ;;  %v85_v27 = vlaneseq }
  0x4b   :  { %163 = vmatprep.mubr.f32.mxu0 %v594_v0  ;;  %431 = vmatprep.subr.bf16.mxu1 %v595_v1  ;;  %v75_v4 = vld [vmem:[#allocation5] sm:$0xff]  ;;  %v423_v5 = vpack.c.bf16 %v78_v3, %v76_v2  ;;  %v77_v6 = vld [vmem:[#allocation5 + $0x10] sm:$0xff]  ;;  %v80_v7 = vld [vmem:[#allocation5 + $0x28] sm:$0xff]  ;;  %vm95_vm0 = vcmask 261120   ;;  %vm596_vm1 = vmmov 0   ;;  %vm183_vm2 = vcmask 523264  }
  0x4c   :  { %v82_v8 = vld [vmem:[#allocation5 + $0x38] sm:$0xff]  ;;  %v425_v9 = vpack.c.bf16 %v77_v6, %v75_v4  ;;  %v79_v11 = vld [vmem:[#allocation5 + $0x20] sm:$0xff]  ;;  %v81_v12 = vld [vmem:[#allocation5 + $0x30] sm:$0xff]  ;;  %401 = vmatprep.mubr.msk.f32.mxu1 %vm596_vm1, %v594_v0  ;;  %v86_v28 = vshrl.u32 %v85_v27, 7  ;;  %s597_s1 = smov 64  }
  0x4d   :  { %v427_v10 = vpack.c.bf16 %v82_v8, %v80_v7  ;;  %424 = vmatprep.subr.bf16.mxu0 %v423_v5  ;;  %v171_v13 = vld [vmem:[#allocation7] sm:$0xff]  ;;  %v172_v14 = vld [vmem:[#allocation7 + $0x8] sm:$0xff]  ;;  %v173_v15 = vld [vmem:[#allocation7 + $0x10] sm:$0xff]  ;;  %v429_v16 = vpack.c.bf16 %v81_v12, %v79_v11 }
  0x4e   :  { %426 = vmatpush1.bf16.msra.mxu0 %v425_v9  ;;  %v432_v17 = vpack.c.bf16 %v172_v14, %v171_v13  ;;  %v174_v18 = vld [vmem:[#allocation7 + $0x18] sm:$0xff]  ;;  %v175_v20 = vld [vmem:[#allocation7 + $0x20] sm:$0xff]  ;;  %v176_v21 = vld [vmem:[#allocation7 + $0x28] sm:$0xff]  ;;  %v87_v35 = vsub.s32 0, %v86_v28  ;;  %v91_v55 = vsub.s32 1, %v86_v28 }
  0x4f   :  { %428 = vmatprep.subr.bf16.mxu0 %v427_v10  ;;  %v435_v19 = vpack.c.bf16 %v174_v18, %v173_v15  ;;  %v74_v22 = vld [vmem:[#allocation2] sm:$0xff]  ;;  %v438_v23 = vpack.c.bf16 %v176_v21, %v175_v20  ;;  %v177_v24 = vld [vmem:[#allocation7 + $0x30] sm:$0xff]  ;;  %v258_v29 = vld [vmem:[#allocation8] sm:$0xff] }
  0x50   :  { %433 = vmatpush3.bf16.msra.mxu1 %v432_v17  ;;  %v178_v25 = vld [vmem:[#allocation7 + $0x38] sm:$0xff]  ;;  %v259_v30 = vld [vmem:[#allocation8 + $0x8] sm:$0xff]  ;;  %v260_v31 = vld [vmem:[#allocation8 + $0x10] sm:$0xff] }
  0x51   :  { %434 = vmatprep.subr.bf16.mxu1 %v595_v1  ;;  %v441_v26 = vpack.c.bf16 %v178_v25, %v177_v24  ;;  %v444_v32 = vpack.c.bf16 %v259_v30, %v258_v29  ;;  %v261_v33 = vld [vmem:[#allocation8 + $0x18] sm:$0xff]  ;;  %v262_v36 = vld [vmem:[#allocation8 + $0x20] sm:$0xff]  ;;  %v263_v37 = vld [vmem:[#allocation8 + $0x28] sm:$0xff] }
  0x52   :  { %430 = vmatpush1.bf16.msra.mxu0 %v429_v16  ;;  %v447_v34 = vpack.c.bf16 %v261_v33, %v260_v31  ;;  %v83_v38 = vld [vmem:[%s706_s2] sm:$0x3]  ;;  %v450_v39 = vpack.c.bf16 %v263_v37, %v262_v36  ;;  %v264_v45 = vld [vmem:[#allocation8 + $0x30] sm:$0xff]  ;;  %s598_s2 = smov [#allocation10]  }
  0x53   :  { %443 = vmatprep.subr.bf16.mxu0 %v595_v1  ;;  %v88_v40 = vrot.slane %v83_v38, %v87_v35  ;;  %v265_v46 = vld [vmem:[#allocation8 + $0x38] sm:$0xff]  ;;  %v92_v56 = vrot.slane %v83_v38, %v91_v55  ;;  %s353_s18 = sshll.u32 %s598_s2, 4  ;;  %s354_s18 = int_to_ptr.vmem [resolvable:$true] %s353_s18 }
  0x54   :  { %436 = vmatpush3.bf16.msra.mxu1 %v435_v19  ;;  %v453_v47 = vpack.c.bf16 %v265_v46, %v264_v45  ;;  %s556_s19 = scalar_lea.vmem %s354_s18, 256  ;;  %p561_p5 = scmp.lt.s32.totalorder %s354_s18, %s354_s18 }
  0x55   :  { %364 = vmatmul.mubr.msk.f32.vlgmr.msra.gmra.mrb[0].mxu0 %vm95_vm0, %v74_v22  ;;  %437 = vmatprep.subr.bf16.mxu1 %v595_v1  ;;  %p557_p4 = scmp.ne.s32.totalorder %s354_s18, %s556_s19  ;;  %p562_p6 = scmp.lt.s32.totalorder %s556_s19, %s556_s19 }
  0x56   :  { %420 = vmatprep.mubr.msk.f32.mxu0 %vm596_vm1, %v594_v0  ;;  %445 = vmatpush3.bf16.msra.mxu0 %v444_v32 }
  0x57   :  { %446 = vmatprep.subr.bf16.mxu0 %v595_v1  ;;  %p563_p7 = por %p562_p6, %p561_p5 }
  0x58   :  { %439 = vmatpush3.bf16.msra.mxu1 %v438_v23 }
  0x59   :  { %440 = vmatprep.subr.bf16.mxu1 %v595_v1  ;;  %p564_p8 = pnand %p563_p7, %p557_p4 }
  0x5a   :  { %448 = vmatpush3.bf16.msra.mxu0 %v447_v34 }
  0x5b   :  { %449 = vmatprep.subr.bf16.mxu0 %v595_v1 }
  0x5c   :  { %442 = vmatpush3.bf16.msra.mxu1 %v441_v26 }
  0x5e   :  { %451 = vmatpush3.bf16.msra.mxu0 %v450_v39 }
  0x5f   :  { %452 = vmatprep.subr.bf16.mxu0 %v595_v1 }
  0x62   :  { %454 = vmatpush3.bf16.msra.mxu0 %v453_v47 }
 0x128   :  { %v165_v41 = vpop.f32.mrb[0].mxu0 }
 0x129   :  { %v166_v42 = vadd.f32 %v165_v41, %v88_v40  ;;  %v167_v43 = vpop.f32.mrb[1].mxu0 }
 0x12a   :  { %v168_v57 = vadd.f32 %v167_v43, %v92_v56 }
 0x12b   :  { %v170_v44 = vmax.f32 %v166_v42, 0.0  ;;  %180 = vrot.lane.b32.xlu0 %v166_v42, %s597_s1 }
 0x12d   :  { %402 = vmatmul.mubr.msk.f32.vlgmr.msra.gmra.mrb[0].mxu1 %vm183_vm2, %v170_v44 }
 0x19d   :  { %v181_v48 = vpop.permute.xlu0 %180 }
 0x200   :  { %v253_v49 = vpop.f32.mrb[0].mxu1 }
 0x201   :  { %v254_v50 = vadd.f32 %v253_v49, %v181_v48  ;;  %v403_v51 = vpop.f32.mrb[1].mxu1 }
 0x203   :  { %v257_v52 = vmax.f32 %v254_v50, 0.0 }
 0x205   :  { %340 = vrot.lane.b32.xlu0 %v257_v52, %s597_s1  ;;  %421 = vmatmul.mubr.msk.f32.vlgmr.msra.gmra.mrb[2].mxu0 %vm183_vm2, %v257_v52 }
 0x277   :  { %v341_v53 = vpop.permute.xlu0 %340 }
 0x278   :  { %v343_v54 = vsel %vm183_vm2, %v170_v44, %v341_v53 }
 0x279   :  { %345 = vst [vmem:[#allocation10] sm:$0xff] %v343_v54 }
 0x2d8   :  { %v335_v58 = vpop.f32.mrb[2].mxu0 }
 0x2d9   :  { %v336_v59 = vadd.f32 %v335_v58, %v168_v57  ;;  %v422_v60 = vpop.f32.mrb[3].mxu0 }
 0x2db   :  { %v339_v61 = vmax.f32 %v336_v59, 0.0 }
 0x2dd   :  { %v344_v62 = vsel %vm183_vm2, %v339_v61, 0.0 }
 0x2de   :  { %346 = vst [vmem:[#allocation10 + $0x8] sm:$0xff] %v344_v62 }
 0x2df   :  { %567 = shalt.err (!%p564_p8)
}
 0x2e0   :  { %s568_s22 = scalar_lea.hbm %s709_s5, 256 }
 0x2e1   :  { %p569_p9 = scmp.ne.s32.totalorder %s709_s5, %s568_s22  ;;  %p572_p10 = scmp.lt.u32.totalorder %s568_s22, %s709_s5 }
 0x2e3   :  { %p574_p11 = pnand %p572_p10, %p569_p9 }
 0x2e5   :  { %577 = shalt.err (!%p574_p11)
}
 0x2e6   :  { %356 = dma.vmem_to_hbm [thread:$0]  %s354_s18, 256, %s709_s5, [#allocation4]  }
 0x2e7   :  { %584 = dma.done.wait [#allocation4], 256  }
 0x2e8   :  { %585 = vsyncadd [#allocation4], 4294967040 }
 0x2e9   :  { %360 = vsyncpa [#allocation3], 1 }
 0x2ea   :  { %361 = vsyncpa [#allocation6], 1 }
 0x2eb   :  { %362 = vsyncpa [#allocation9], 1 }
 0x2ec   :  { %363 = vsyncpa [#allocation4], 1 }

</bundles_post_ra>
